<compile_context>
chip_gen: v6e
topology: v6e:2x2x1
jax: 0.10.0
libtpu: 0.0.40
codegen_flags: <defaults>
</compile_context>

<pallas_src>
import functools

import jax
import jax.numpy as jnp
from jax import lax
from jax.experimental import pallas as pl
from jax.experimental.pallas import tpu as pltpu


def _cdiv(a: int, b: int) -> int:
    return (a + b - 1) // b


def _round_up(x: int, m: int) -> int:
    return _cdiv(x, m) * m


def _vmem_budgets():
    """(feature-tile budget, scoped-vmem ceiling) chosen per chip generation."""
    try:
        cap = pltpu.get_tpu_info().vmem_capacity_bytes
    except Exception:
        cap = 64 << 20  # be v7x-conservative if the query is unavailable
    if cap >= (100 << 20):          # v5e / v6e: 128 MiB VMEM per core
        return 56 << 20, 96 << 20
    return 24 << 20, 48 << 20       # v7x: 64 MiB VMEM per core


def _choose_tk(c: int, hw: int, itemsize: int, tile_budget_bytes: int) -> int:
    """Pick the K (lane) tile size for the streamed (c, hw) feature strip."""
    row_bytes = c * itemsize
    # Small strip: one full-dim tile — no 128 alignment needed, no tail masking.
    if hw * row_bytes <= (4 << 20):
        return hw
    # Byte-based cap: biggest lane-dense tile whose 2 double-buffered copies fit
    # the budget, but keep >= ~4 grid steps so DMA overlaps the MXU.
    budget_tk = max(1, tile_budget_bytes // (2 * row_bytes))
    pipeline_tk = max(1, _cdiv(hw, 4))
    tk = min(budget_tk, pipeline_tk)
    tk = max(128, (tk // 128) * 128)
    return min(tk, _round_up(hw, 128))


def _gram_partial_kernel(feat_ref, g_ref, *, hw, tk, kt_half, mask_tail):
    """One grid step: accumulate this split's F_tile @ F_tile^T into g_ref.

    feat_ref: (c, tk)  native dtype, VMEM  (current K tile of the features)
    g_ref   : (c, c)   f32, VMEM           (output partial gram; resident accumulator)
    """
    p = pl.program_id(0)   # reduction split (parallel axis — one per TensorCore)
    k = pl.program_id(1)   # K tile within this split (arbitrary / reduction axis)

    @pl.when(k == 0)
    def _init():
        g_ref[...] = jnp.zeros_like(g_ref)

    f = feat_ref[...]

    def _ata(a):
        # A @ A^T contracting the lane (tk) axis; f32 accumulation on the MXU.
        return lax.dot_general(a, a, (((1,), (1,)), ((), ())),
                               preferred_element_type=jnp.float32)

    if not mask_tail:
        g_ref[...] += _ata(f)
    else:
        gk = p * kt_half + k            # unclamped global K-tile index

        @pl.when(gk * tk + tk <= hw)    # fully in-bounds tile
        def _full():
            g_ref[...] += _ata(f)

        @pl.when(gk * tk + tk > hw)     # partial (or fully out-of-range) tail tile
        def _tail():
            col = gk * tk + lax.broadcasted_iota(jnp.int32, f.shape, 1)
            fm = jnp.where(col < hw, f, jnp.zeros_like(f))
            g_ref[...] += _ata(fm)


def gram_matrix(x_nchw, *, tk=None):
    """Pallas gram matrix: (1,C,H,W) -> f32 (C,C) = (F @ F^T) / (C*H*W)."""
    b, c, h, w = x_nchw.shape
    assert b == 1, "torch's .view(c, h*w) implies batch == 1"
    hw = h * w
    feat = x_nchw.reshape(c, hw)            # native dtype; no HBM pad copy
    itemsize = jnp.dtype(feat.dtype).itemsize

    tile_budget, vmem_ceiling = _vmem_budgets()
    if tk is None:
        tk = _choose_tk(c, hw, itemsize, tile_budget)
    kt_total = _cdiv(hw, tk)

    # Split the K reduction across both TensorCores on v7x (serial, harmless on
    # 1-TC chips); each split accumulates a partial gram that is summed in JAX.
    num_splits = 2 if kt_total >= 2 else 1
    kt_half = _cdiv(kt_total, num_splits)
    mask_tail = (num_splits * kt_half * tk) != hw

    def feat_index_map(p, k):
        # Clamp so a split whose last tile starts past hw still maps to a valid
        # block (its contribution is fully masked to zero in the kernel).
        return (0, jnp.minimum(p * kt_half + k, kt_total - 1))

    kernel = functools.partial(
        _gram_partial_kernel, hw=hw, tk=tk, kt_half=kt_half, mask_tail=mask_tail)

    # Double-buffered feature tiles + double-buffered (c,c) output block + slack.
    need = 2 * c * tk * itemsize + 2 * c * c * 4
    vmem_limit = int(min(max(int(1.5 * need) + (2 << 20), 32 << 20), vmem_ceiling))

    partials = pl.pallas_call(
        kernel,
        out_shape=jax.ShapeDtypeStruct((num_splits, c, c), jnp.float32),
        grid_spec=pltpu.PrefetchScalarGridSpec(
            num_scalar_prefetch=0,
            grid=(num_splits, kt_half),
            in_specs=[pl.BlockSpec((c, tk), feat_index_map)],
            out_specs=pl.BlockSpec((None, c, c), lambda p, k: (p, 0, 0)),
        ),
        compiler_params=pltpu.CompilerParams(
            dimension_semantics=("parallel", "arbitrary"),
            vmem_limit_bytes=vmem_limit,
        ),
    )(feat)

    # Sum the per-core partials and apply the 1/(C*H*W) scale in plain JAX
    # (O(C^2), bandwidth-negligible).  Everything stays f32.
    return partials.sum(axis=0) * (1.0 / float(c * h * w))


def gram_and_loss(x_nchw, target_gram):
    """Returns (G, loss) with the MSE epilogue done in f32 plain JAX."""
    g = gram_matrix(x_nchw)
    t = target_gram.astype(jnp.float32)     # never downcast the target
    loss = jnp.mean((g - t) ** 2)
    return g, loss


class StyleLossPallas:
    """JAX/Pallas equivalent of the PyTorch StyleLoss module."""

    def __init__(self, target_feature):
        # Target gram matrix ("detached" — just a constant f32 array here).
        self.target = gram_matrix(target_feature)

    def __call__(self, x):
        # TODO(synk): mutating self.loss works eagerly but is not jit/scan-safe;
        # traced code should call gram_and_loss() directly.
        _, self.loss = gram_and_loss(x, self.target)
        return x  # forward returns its input unchanged


def _gram_ref(x):
    b, c, h, w = x.shape
    f = x.reshape(c, h * w).astype(jnp.float32)
    g = lax.dot_general(f, f, (((1,), (1,)), ((), ())),
                        precision=lax.Precision.HIGHEST)
    return g / (c * h * w)


if __name__ == "__main__":
    key = jax.random.PRNGKey(0)
    k_tgt, k_in, k2 = jax.random.split(key, 3)

    # Small shapes consistent with the module (batch must be 1 for torch's view).
    target_feature = jax.random.normal(k_tgt, (1, 4, 16, 16), dtype=jnp.float32)
    x = jax.random.normal(k_in, (1, 4, 16, 16), dtype=jnp.float32)

    module = StyleLossPallas(target_feature)
    out = jax.block_until_ready(module(x))
    loss = jax.block_until_ready(module.loss)

    # Correctness vs a pure-JAX reference (single-tile path).
    g_ref = _gram_ref(x)
    t_ref = _gram_ref(target_feature)
    loss_ref = jnp.mean((g_ref - t_ref) ** 2)
    assert jnp.allclose(out, x), "forward must return its input unchanged"
    assert jnp.allclose(module.target, t_ref, rtol=2e-5, atol=1e-5)
    assert jnp.allclose(loss, loss_ref, rtol=1e-4, atol=1e-7), (loss, loss_ref)

    # Also exercise the tiled path (multi K-tile, 2-way split, clamped + masked
    # tail): hw = 300 -> kt_total = 3 with tk = 128.
    x2 = jax.random.normal(k2, (1, 16, 15, 20), dtype=jnp.float32)
    g2 = jax.block_until_ready(gram_matrix(x2, tk=128))
    assert jnp.allclose(g2, _gram_ref(x2), rtol=2e-5, atol=1e-5), "tiled path mismatch"

    print("KERNEL_OK")
</pallas_src>

<mosaic_0001>
module attributes {stable_mosaic.version = 11 : i64} {
  func.func @_gram_partial_kernel(%arg0: i32, %arg1: i32, %arg2: memref<4x256xf32, #tpu.memory_space<vmem>>, %arg3: memref<1x4x4xf32, #tpu.memory_space<vmem>>) attributes {dimension_semantics = [#tpu.dimension_semantics<parallel>, #tpu.dimension_semantics<arbitrary>], iteration_bounds = array<i64: 1, 1>, scalar_prefetch = 0 : i64, scratch_operands = 0 : i64, tpu.core_type = #tpu.core_type<tc>, window_params = [{transform_indices = @transform_0, window_bounds = array<i64: 4, 256>}, {transform_indices = @transform_1, window_bounds = array<i64: 1, 4, 4>}]} {
    %c0_i32 = arith.constant 0 : i32
    %0 = arith.cmpi eq, %arg1, %c0_i32 : i32
    %1 = arith.extui %0 : i1 to i32
    %c0_i32_0 = arith.constant 0 : i32
    %2 = arith.cmpi ne, %1, %c0_i32_0 : i32
    scf.if %2 {
      %cst_8 = arith.constant 0.000000e+00 : f32
      %11 = vector.broadcast %cst_8 : f32 to vector<4x4xf32>
      %c0_9 = arith.constant 0 : index
      %c0_10 = arith.constant 0 : index
      %c0_11 = arith.constant 0 : index
      %12 = vector.load %arg3[%c0_9, %c0_10, %c0_11] : memref<1x4x4xf32, #tpu.memory_space<vmem>>, vector<1x4x4xf32>
      %13 = vector.shape_cast %12 : vector<1x4x4xf32> to vector<4x4xf32>
      %14 = vector.shape_cast %11 : vector<4x4xf32> to vector<1x4x4xf32>
      tpu.vector_store %arg3[%c0_9, %c0_10, %c0_11], %14 {strides = array<i32>} : memref<1x4x4xf32, #tpu.memory_space<vmem>>, vector<1x4x4xf32>,
    } else {
    }
    %c0 = arith.constant 0 : index
    %c0_1 = arith.constant 0 : index
    %3 = vector.load %arg2[%c0, %c0_1] : memref<4x256xf32, #tpu.memory_space<vmem>>, vector<4x256xf32>
    %c0_2 = arith.constant 0 : index
    %c0_3 = arith.constant 0 : index
    %c0_4 = arith.constant 0 : index
    %4 = vector.load %arg3[%c0_2, %c0_3, %c0_4] : memref<1x4x4xf32, #tpu.memory_space<vmem>>, vector<1x4x4xf32>
    %5 = vector.shape_cast %4 : vector<1x4x4xf32> to vector<4x4xf32>
    %cst = arith.constant dense<0.000000e+00> : vector<4x4xf32>
    %6 = tpu.matmul %3, %3, %cst {dimension_numbers = #tpu.dot_dimension_numbers<[1], [1], [0], [0], [0, 0, 1, 0], [], []>} : vector<4x256xf32>, vector<4x256xf32>, vector<4x4xf32> -> vector<4x4xf32>
    %7 = arith.addf %5, %6 : vector<4x4xf32>
    %c0_5 = arith.constant 0 : index
    %c0_6 = arith.constant 0 : index
    %c0_7 = arith.constant 0 : index
    %8 = vector.load %arg3[%c0_5, %c0_6, %c0_7] : memref<1x4x4xf32, #tpu.memory_space<vmem>>, vector<1x4x4xf32>
    %9 = vector.shape_cast %8 : vector<1x4x4xf32> to vector<4x4xf32>
    %10 = vector.shape_cast %7 : vector<4x4xf32> to vector<1x4x4xf32>
    tpu.vector_store %arg3[%c0_5, %c0_6, %c0_7], %10 {strides = array<i32>} : memref<1x4x4xf32, #tpu.memory_space<vmem>>, vector<1x4x4xf32>,
    return
  }
  func.func @transform_0(%arg0: i32, %arg1: i32) -> (i32, i32) {
    %c1_i32 = arith.constant 1 : i32
    %0 = arith.muli %arg0, %c1_i32 : i32
    %1 = arith.addi %0, %arg1 : i32
    %c0_i32 = arith.constant 0 : i32
    %2 = arith.minsi %1, %c0_i32 : i32
    %c0_i32_0 = arith.constant 0 : i32
    %c0_i32_1 = arith.constant 0 : i32
    return %c0_i32_0, %2 : i32, i32
  }
  func.func @transform_1(%arg0: i32, %arg1: i32) -> (i32, i32, i32) {
    %c0_i32 = arith.constant 0 : i32
    %c0_i32_0 = arith.constant 0 : i32
    %c0_i32_1 = arith.constant 0 : i32
    return %arg0, %c0_i32, %c0_i32_0 : i32, i32, i32
  }
}

</mosaic_0001>

<bundles_post_ra>
// kernel: tpu_custom_call.1
= control target key start
LH: loop header
LB: loop body
LE: loop exit
PB: predicated region body
PF: predicated region fallthrough
CT: control target
= control target key end

     0   :  { %6 = vsyncpa [#allocation3], 0  ;;  %s201_s0 = inlined_call_operand.hbm [shape: f32[4,256], index: 0, kind: input, shape index: {}]   ;;  %s202_s1 = inlined_call_operand.hbm [shape: f32[1,4,4], index: 1, kind: output, shape index: {}]  }
   0x1   :  { %7 = vsyncpa [#allocation4], 0  ;;  %s180_s6 = smov [#allocation2]  }
   0x2   :  { %s20_s7 = sshll.u32 %s180_s6, 4  ;;  %s21_s7 = int_to_ptr.vmem [resolvable:$true] %s20_s7 }
   0x3   :  { %s144_s8 = scalar_lea.vmem %s21_s7, 128  ;;  %p149_p1 = scmp.lt.s32.totalorder %s21_s7, %s21_s7 }
   0x4   :  { %p145_p0 = scmp.ne.s32.totalorder %s21_s7, %s144_s8  ;;  %p150_p2 = scmp.lt.s32.totalorder %s144_s8, %s144_s8 }
   0x6   :  { %p151_p3 = por %p150_p2, %p149_p1 }
   0x8   :  { %p152_p4 = pnand %p151_p3, %p145_p0 }
   0xa   :  { %155 = shalt.err (!%p152_p4)
}
   0xb   :  { %23 = dma.hbm_to_vmem [thread:$0]  %s201_s0, 128, %s21_s7, [#allocation3]  }
   0xc   :  { %176 = dma.done.wait [#allocation3], 128  }
   0xd   :  { %177 = vsyncadd [#allocation3], 4294967168  ;;  %vm35_vm0 = vcmask 27648   ;;  %v181_v0 = vmov 0.0   ;;  %v37_v1 = vld [vmem:[#allocation2] sm:$0xff]  ;;  %s182_s11 = smov [#allocation5]  }
   0xe   :  { %36 = vst.msk [vmem:[#allocation5] sm:$0xf] %vm35_vm0, %v181_v0  ;;  %v40_v2 = vcombine.high %v37_v1, %v37_v1  ;;  %s121_s12 = sshll.u32 %s182_s11, 4  ;;  %s122_s12 = int_to_ptr.vmem [resolvable:$true] %s121_s12 }
   0xf   :  { %s156_s0 = scalar_lea.vmem %s122_s12, 64  ;;  %p161_p6 = scmp.lt.s32.totalorder %s122_s12, %s122_s12 }
  0x10   :  { %72 = vmatprep.subr.mxu0 %v40_v2  ;;  %106 = vmatprep.mubr.f32.mxu0 %v40_v2  ;;  %p157_p5 = scmp.ne.s32.totalorder %s122_s12, %s156_s0  ;;  %p162_p7 = scmp.lt.s32.totalorder %s156_s0, %s156_s0 }
  0x11   :  { %73 = vmatpush1.xpose.msra.mxu0 %v37_v1 }
  0x12   :  { %p163_p8 = por %p162_p7, %p161_p6 }
  0x14   :  { %107 = vmatmul.mubr.f32.vlgmr.msra.gmra.mxu0 %v37_v1  ;;  %p164_p9 = pnand %p163_p8, %p157_p5 }
  0x15   :  { %v38_v3 = vld [vmem:[#allocation5] sm:$0xf] }
  0xd4   :  { %v108_v4 = vpop.f32.mrf.mxu0 }
  0xd5   :  { %v112_v5 = vadd.f32 %v108_v4, %v38_v3 }
  0xd6   :  { %v110_v6 = vpop.f32.mrf.mxu0 }
  0xd7   :  { %114 = vst.msk [vmem:[#allocation5] sm:$0xf] %vm35_vm0, %v112_v5 }
  0xd8   :  { %167 = shalt.err (!%p164_p9)
}
  0xd9   :  { %124 = dma.vmem_to_hbm [thread:$0]  %s122_s12, 64, %s202_s1, [#allocation4]  }
  0xda   :  { %178 = dma.done.wait [#allocation4], 64  }
  0xdb   :  { %179 = vsyncadd [#allocation4], 4294967232 }
  0xdc   :  { %128 = vsyncpa [#allocation3], 1 }
  0xdd   :  { %129 = vsyncpa [#allocation4], 1 }

</bundles_post_ra>
